<compile_context>
chip_gen: v6e
topology: v6e:2x2x1
jax: 0.10.0
libtpu: 0.0.40
codegen_flags: <defaults>
</compile_context>

<pallas_src>
import functools

import jax
import jax.numpy as jnp
from jax.experimental import pallas as pl
from jax.experimental.pallas import tpu as pltpu


# ---------------------------------------------------------------------------
# Kernel 1: LSTM cell + FF1 + p_gen  (all small work, single block, no grid)
# ---------------------------------------------------------------------------
def lstm_pgen_kernel(
    emb_ref, h_ref, c_ref, ctx_ref,
    wih_ref, whh_ref, bl_ref,            # (E,4H), (H,4H), (1,4H)
    w1h_ref, w1c_ref, b1_ref,            # (H,H), (2H,H), (1,H)
    wgc_ref, wgh_ref, wgcc_ref, wge_ref, bg_ref,   # (1,2H),(1,H),(1,H),(1,E),(1,1)
    hout_ref, cout_ref, ff1_ref, pgen_ref,
):
    emb = emb_ref[...]                   # (B, E)
    h   = h_ref[...]                     # (B, H)
    c   = c_ref[...]                     # (B, H)
    ctx = ctx_ref[...]                   # (B, 2H)
    H = h_ref.shape[-1]

    # Two fused gate matmuls (gate column order i, f, g, o).
    wih = wih_ref[...].astype(jnp.float32)
    whh = whh_ref[...].astype(jnp.float32)
    gates = (jnp.dot(emb, wih, preferred_element_type=jnp.float32)
             + jnp.dot(h, whh, preferred_element_type=jnp.float32)
             + bl_ref[...])
    i_g = jax.nn.sigmoid(gates[:, 0 * H:1 * H])
    f_g = jax.nn.sigmoid(gates[:, 1 * H:2 * H])
    g_g = jnp.tanh(gates[:, 2 * H:3 * H])
    o_g = jax.nn.sigmoid(gates[:, 3 * H:4 * H])

    c_new = f_g * c + i_g * g_g
    h_new = o_g * jnp.tanh(c_new)
    hout_ref[...] = h_new
    cout_ref[...] = c_new

    # FF1(cat[h_new, ctx]) without an in-kernel concatenate: W1 pre-split.
    ff1 = (jnp.dot(h_new, w1h_ref[...].astype(jnp.float32),
                   preferred_element_type=jnp.float32)
           + jnp.dot(ctx, w1c_ref[...].astype(jnp.float32),
                     preferred_element_type=jnp.float32)
           + b1_ref[...])
    ff1_ref[...] = ff1.astype(ff1_ref.dtype)      # stored in W2 dtype (bf16)

    # p_gen = sigmoid(w_gen(cat[ctx, h_new, c_new, emb])) as VPU multiplies +
    # lane reductions (N=1 output; no MXU issue, no concatenate).
    pg = (jnp.sum(ctx * wgc_ref[...], axis=-1, keepdims=True)
          + jnp.sum(h_new * wgh_ref[...], axis=-1, keepdims=True)
          + jnp.sum(c_new * wgcc_ref[...], axis=-1, keepdims=True)
          + jnp.sum(emb * wge_ref[...], axis=-1, keepdims=True)
          + bg_ref[...])
    pgen_ref[...] = jax.nn.sigmoid(pg)


# ---------------------------------------------------------------------------
# Kernel 2: fused vocab projection + softmax.
#   Grid iterates vocab tiles; p_ref is the full (B, V_pad) output, resident in
#   VMEM (constant index_map).  Logits are stashed into p_ref tile by tile while
#   row max / sum are accumulated online; the last step normalizes in place.
#   No logits HBM round-trip, single output writeback at the end.
# ---------------------------------------------------------------------------
def vocab_softmax_kernel(ff1_ref, w2_ref, b2_ref, p_ref, m_ref, l_ref):
    j = pl.program_id(0)
    nj = pl.num_programs(0)
    tn = w2_ref.shape[1]

    @pl.when(j == 0)
    def _():
        m_ref[...] = jnp.full(m_ref.shape, -jnp.inf, m_ref.dtype)
        l_ref[...] = jnp.zeros(l_ref.shape, l_ref.dtype)

    logits = (jnp.dot(ff1_ref[...], w2_ref[...],
                      preferred_element_type=jnp.float32)
              + b2_ref[...])                               # (B, tn) f32

    off = pl.multiple_of(j * tn, 128)
    p_ref[:, pl.ds(off, tn)] = logits                      # stash in resident out

    m_prev = m_ref[...]
    m_new = jnp.maximum(m_prev, jnp.max(logits, axis=-1, keepdims=True))
    l_ref[...] = (l_ref[...] * jnp.exp(m_prev - m_new)
                  + jnp.sum(jnp.exp(logits - m_new), axis=-1, keepdims=True))
    m_ref[...] = m_new

    @pl.when(j == nj - 1)
    def _():
        inv_l = pl.reciprocal(l_ref[...], approx=False)
        p_ref[...] = jnp.exp(p_ref[...] - m_ref[...]) * inv_l


# ---------------------------------------------------------------------------
# VMEM budget / tile selection (pure Python, trace-time only)
# ---------------------------------------------------------------------------
def _vmem_limit_bytes():
    """HW-aware scoped-VMEM limit (v7x has 64 MiB physical vs 128 on v5e/v6e)."""
    try:
        cap = int(pltpu.get_tpu_info().vmem_capacity_bytes)
    except Exception:
        cap = 64 * 1024 * 1024          # conservative (v7x physical)
    return int(min(cap // 2, 64 * 1024 * 1024))


def _choose_vocab_tile(V, H, b_pad, w2_itemsize, vmem_limit=None):
    """Largest lane-aligned vocab tile (cap 8192) whose working set fits:
    double-buffered W2/bias tile + resident p_vocab output + FF1."""
    if vmem_limit is None:
        vmem_limit = _vmem_limit_bytes()
    budget = (vmem_limit * 3) // 4                      # headroom
    v128 = pl.cdiv(V, 128) * 128
    cands = ([v128] if v128 <= 8192 else []) + \
            [t for t in (8192, 4096, 2048, 1024, 512, 256, 128) if t < v128]
    for tn in cands:
        v_pad = pl.cdiv(V, tn) * tn
        resident = b_pad * v_pad * 4 + b_pad * H * w2_itemsize + 256
        per_tile = 2 * (H * tn * w2_itemsize + tn * 4)  # double-buffered
        if resident + per_tile <= budget:
            return tn
    return 128


# ---------------------------------------------------------------------------
# Weight preparation: run ONCE outside the decode loop.
# ---------------------------------------------------------------------------
def prepare_decoder_params(params, w2_dtype=jnp.bfloat16, lstm_dtype=jnp.float32,
                           vocab_tile_n=None, max_batch=8):
    """Returns (prep_dict_of_arrays_only, vocab_tile_n).

    lstm_dtype can be set to bf16 to halve kernel-1 weight DMA (per perf review)
    at the cost of ~1e-3 relative error on h/c; default keeps f32 for tight
    state tolerances."""
    H = params["w_hh"].shape[1]
    V = params["W2_w"].shape[0]

    wih = params["w_ih"].T.astype(lstm_dtype)            # (E, 4H), gates i,f,g,o
    whh = params["w_hh"].T.astype(lstm_dtype)            # (H, 4H)
    bl = (params["b_ih"] + params["b_hh"])[None, :].astype(jnp.float32)  # (1, 4H)

    w1_t = params["W1_w"].T                              # (3H, H)
    w1h = w1_t[:H].astype(lstm_dtype)                    # (H, H)  -- dec_out rows
    w1c = w1_t[H:].astype(lstm_dtype)                    # (2H, H) -- context rows
    b1 = params["W1_b"][None, :].astype(jnp.float32)     # (1, H)

    w2 = params["W2_w"].T.astype(w2_dtype)               # (H, V) bf16
    b2 = params["W2_b"][None, :].astype(jnp.float32)     # (1, V)

    # Pick vocab tile and pad the vocab axis to a tile multiple ONCE, so the
    # fused projection+softmax kernel never sees a partial block.  Padded
    # logits get bias -1e9 -> exp underflows to exactly 0 -> softmax unaffected.
    b_pad = ((max_batch + 7) // 8) * 8
    tn = vocab_tile_n or _choose_vocab_tile(V, H, b_pad, jnp.dtype(w2_dtype).itemsize)
    V_pad = pl.cdiv(V, tn) * tn
    if V_pad != V:
        w2 = jnp.pad(w2, ((0, 0), (0, V_pad - V)))
        b2 = jnp.pad(b2, ((0, 0), (0, V_pad - V)), constant_values=-1e9)

    wg = params["wgen_w"]                                # (1, 4H+E); cat ctx,h,c,emb
    prep = dict(
        embedding=params["embedding"],
        wih=wih, whh=whh, bl=bl,
        w1h=w1h, w1c=w1c, b1=b1,
        w2=w2, b2=b2,
        wg_ctx=wg[:, : 2 * H], wg_h=wg[:, 2 * H: 3 * H],
        wg_c=wg[:, 3 * H: 4 * H], wg_e=wg[:, 4 * H:],
        bg=params["wgen_b"][None, :],
    )
    return prep, int(tn)


# ---------------------------------------------------------------------------
# Forward wrapper (mirrors Decoder.forward)
# ---------------------------------------------------------------------------
@functools.partial(jax.jit, static_argnames=("vocab_tile_n",))
def decoder_forward(x_t, decoder_states, context_vector, prep, vocab_tile_n):
    """x_t (B,1) int32, states (1,B,H) each, context_vector (B,2H).
    Returns p_vocab (B,V), (h,c) each (1,B,H), p_gen (B,1)."""
    h0, c0 = decoder_states
    B = x_t.shape[0]
    H = h0.shape[-1]                       # static: from array shapes, not prep
    V = prep["embedding"].shape[0]
    V_pad = prep["w2"].shape[1]
    tn = int(vocab_tile_n)
    assert V_pad % tn == 0, "vocab_tile_n must match prepare_decoder_params"
    B_pad = ((B + 7) // 8) * 8             # f32 sublane alignment
    vmem_limit = _vmem_limit_bytes()

    emb = jnp.take(prep["embedding"], x_t[:, 0], axis=0)   # (B, E) gather in XLA
    h0s, c0s, ctx = h0[0], c0[0], context_vector
    if B_pad != B:
        pad = ((0, B_pad - B), (0, 0))
        emb = jnp.pad(emb, pad)
        h0s = jnp.pad(h0s, pad)
        c0s = jnp.pad(c0s, pad)
        ctx = jnp.pad(ctx, pad)

    vmem = pl.BlockSpec(memory_space=pltpu.MemorySpace.VMEM)

    # ---- kernel 1: LSTM cell + FF1 + p_gen (all small work, run once) ------
    h_new, c_new, ff1, p_gen = pl.pallas_call(
        lstm_pgen_kernel,
        out_shape=(
            jax.ShapeDtypeStruct((B_pad, H), jnp.float32),
            jax.ShapeDtypeStruct((B_pad, H), jnp.float32),
            jax.ShapeDtypeStruct((B_pad, H), prep["w2"].dtype),   # bf16 FF1
            jax.ShapeDtypeStruct((B_pad, 1), jnp.float32),
        ),
        in_specs=[vmem] * 15,
        out_specs=(vmem, vmem, vmem, vmem),
        compiler_params=pltpu.CompilerParams(vmem_limit_bytes=vmem_limit),
    )(emb, h0s, c0s, ctx,
      prep["wih"], prep["whh"], prep["bl"],
      prep["w1h"], prep["w1c"], prep["b1"],
      prep["wg_ctx"], prep["wg_h"], prep["wg_c"], prep["wg_e"], prep["bg"])

    # ---- kernel 2: fused vocab projection + softmax -------------------------
    # W2 tiles stream (double-buffered DMA overlaps MXU); p_vocab stays resident
    # in VMEM so logits never touch HBM.  If xprof shows the W2 DMA exposed,
    # pipeline_mode=pl.Buffered(3) on the W2 BlockSpec is a cheap sweep.
    n_tiles = V_pad // tn
    p_full = pl.pallas_call(
        vocab_softmax_kernel,
        out_shape=jax.ShapeDtypeStruct((B_pad, V_pad), jnp.float32),
        grid=(n_tiles,),
        in_specs=[
            pl.BlockSpec((B_pad, H), lambda j: (0, 0)),   # FF1 resident (bf16)
            pl.BlockSpec((H, tn), lambda j: (0, j)),      # W2 tile (pipelined)
            pl.BlockSpec((1, tn), lambda j: (0, j)),      # bias tile
        ],
        out_specs=pl.BlockSpec((B_pad, V_pad), lambda j: (0, 0)),  # resident out
        scratch_shapes=[pltpu.VMEM((B_pad, 1), jnp.float32),       # row max
                        pltpu.VMEM((B_pad, 1), jnp.float32)],      # row sum
        compiler_params=pltpu.CompilerParams(
            dimension_semantics=("arbitrary",),   # output revisited across grid
            vmem_limit_bytes=vmem_limit,
        ),
    )(ff1, prep["w2"], prep["b2"])

    return (p_full[:B, :V],
            (h_new[:B][None], c_new[:B][None]),
            p_gen[:B])


# ---------------------------------------------------------------------------
# Pure-JAX f32 reference (correctness sanity check)
# ---------------------------------------------------------------------------
def decoder_forward_ref(x_t, decoder_states, context_vector, params):
    h0, c0 = decoder_states
    H = h0.shape[-1]
    emb = jnp.take(params["embedding"], x_t[:, 0], axis=0)
    gates = (emb @ params["w_ih"].T + h0[0] @ params["w_hh"].T
             + params["b_ih"] + params["b_hh"])
    i_g = jax.nn.sigmoid(gates[:, 0 * H:1 * H])
    f_g = jax.nn.sigmoid(gates[:, 1 * H:2 * H])
    g_g = jnp.tanh(gates[:, 2 * H:3 * H])
    o_g = jax.nn.sigmoid(gates[:, 3 * H:4 * H])
    c_new = f_g * c0[0] + i_g * g_g
    h_new = o_g * jnp.tanh(c_new)
    concat = jnp.concatenate([h_new, context_vector], axis=-1)
    ff1 = concat @ params["W1_w"].T + params["W1_b"]
    ff2 = ff1 @ params["W2_w"].T + params["W2_b"]
    p_vocab = jax.nn.softmax(ff2, axis=1)
    x_gen = jnp.concatenate([context_vector, h_new, c_new, emb], axis=-1)
    p_gen = jax.nn.sigmoid(x_gen @ params["wgen_w"].T + params["wgen_b"])
    return p_vocab, (h_new[None], c_new[None]), p_gen


def init_params(key, vocab_size, embed_size, hidden_size):
    ks = jax.random.split(key, 10)
    s = 0.1
    return {
        "embedding": s * jax.random.normal(ks[0], (vocab_size, embed_size), jnp.float32),
        "w_ih": s * jax.random.normal(ks[1], (4 * hidden_size, embed_size), jnp.float32),
        "w_hh": s * jax.random.normal(ks[2], (4 * hidden_size, hidden_size), jnp.float32),
        "b_ih": s * jax.random.normal(ks[3], (4 * hidden_size,), jnp.float32),
        "b_hh": s * jax.random.normal(ks[4], (4 * hidden_size,), jnp.float32),
        "W1_w": s * jax.random.normal(ks[5], (hidden_size, 3 * hidden_size), jnp.float32),
        "W1_b": s * jax.random.normal(ks[6], (hidden_size,), jnp.float32),
        "W2_w": s * jax.random.normal(ks[7], (vocab_size, hidden_size), jnp.float32),
        "W2_b": s * jax.random.normal(ks[8], (vocab_size,), jnp.float32),
        "wgen_w": s * jax.random.normal(ks[9], (1, 4 * hidden_size + embed_size), jnp.float32),
        "wgen_b": jnp.zeros((1,), jnp.float32),
    }


if __name__ == "__main__":
    # Small shapes; vocab tile chosen so the fused vocab grid has 2 tiles.
    B, V, E, H = 2, 256, 16, 32

    key = jax.random.PRNGKey(0)
    k_par, k_x, k_h, k_c, k_ctx = jax.random.split(key, 5)
    params = init_params(k_par, V, E, H)
    prep, vocab_tile = prepare_decoder_params(params, w2_dtype=jnp.bfloat16,
                                              vocab_tile_n=128)

    x_t = jax.random.randint(k_x, (B, 1), 0, V, dtype=jnp.int32)
    h0 = 0.1 * jax.random.normal(k_h, (1, B, H), jnp.float32)
    c0 = 0.1 * jax.random.normal(k_c, (1, B, H), jnp.float32)
    context = 0.1 * jax.random.normal(k_ctx, (B, 2 * H), jnp.float32)

    p_vocab, (h_n, c_n), p_gen = decoder_forward(
        x_t, (h0, c0), context, prep, vocab_tile_n=vocab_tile)
    jax.block_until_ready((p_vocab, h_n, c_n, p_gen))

    # Correctness check against the pure-JAX f32 reference (W2 and FF1 are bf16
    # in the kernel, so p_vocab gets a slightly looser tolerance).
    p_vocab_r, (h_r, c_r), p_gen_r = decoder_forward_ref(x_t, (h0, c0), context, params)
    assert p_vocab.shape == (B, V)
    assert jnp.allclose(p_vocab, p_vocab_r, atol=5e-3), "p_vocab mismatch"
    assert jnp.allclose(jnp.sum(p_vocab, axis=-1), 1.0, atol=1e-3), "p_vocab not normalized"
    assert jnp.allclose(h_n, h_r, atol=2e-4), "h_n mismatch"
    assert jnp.allclose(c_n, c_r, atol=2e-4), "c_n mismatch"
    assert jnp.allclose(p_gen, p_gen_r, atol=2e-4), "p_gen mismatch"

    print("KERNEL_OK")
</pallas_src>

<mosaic_0001>
module attributes {stable_mosaic.version = 11 : i64} {
  func.func @lstm_pgen_kernel(%arg0: memref<8x16xf32, #tpu.memory_space<vmem>>, %arg1: memref<8x32xf32, #tpu.memory_space<vmem>>, %arg2: memref<8x32xf32, #tpu.memory_space<vmem>>, %arg3: memref<8x64xf32, #tpu.memory_space<vmem>>, %arg4: memref<16x128xf32, #tpu.memory_space<vmem>>, %arg5: memref<32x128xf32, #tpu.memory_space<vmem>>, %arg6: memref<1x128xf32, #tpu.memory_space<vmem>>, %arg7: memref<32x32xf32, #tpu.memory_space<vmem>>, %arg8: memref<64x32xf32, #tpu.memory_space<vmem>>, %arg9: memref<1x32xf32, #tpu.memory_space<vmem>>, %arg10: memref<1x64xf32, #tpu.memory_space<vmem>>, %arg11: memref<1x32xf32, #tpu.memory_space<vmem>>, %arg12: memref<1x32xf32, #tpu.memory_space<vmem>>, %arg13: memref<1x16xf32, #tpu.memory_space<vmem>>, %arg14: memref<1x1xf32, #tpu.memory_space<vmem>>, %arg15: memref<8x32xf32, #tpu.memory_space<vmem>>, %arg16: memref<8x32xf32, #tpu.memory_space<vmem>>, %arg17: memref<8x32xbf16, #tpu.memory_space<vmem>>, %arg18: memref<8x1xf32, #tpu.memory_space<vmem>>) attributes {dimension_semantics = [], scalar_prefetch = 0 : i64, scratch_operands = 0 : i64, tpu.core_type = #tpu.core_type<tc>} {
    %c0 = arith.constant 0 : index
    %c0_0 = arith.constant 0 : index
    %0 = vector.load %arg0[%c0, %c0_0] : memref<8x16xf32, #tpu.memory_space<vmem>>, vector<8x16xf32>
    %c0_1 = arith.constant 0 : index
    %c0_2 = arith.constant 0 : index
    %1 = vector.load %arg1[%c0_1, %c0_2] : memref<8x32xf32, #tpu.memory_space<vmem>>, vector<8x32xf32>
    %c0_3 = arith.constant 0 : index
    %c0_4 = arith.constant 0 : index
    %2 = vector.load %arg2[%c0_3, %c0_4] : memref<8x32xf32, #tpu.memory_space<vmem>>, vector<8x32xf32>
    %c0_5 = arith.constant 0 : index
    %c0_6 = arith.constant 0 : index
    %3 = vector.load %arg3[%c0_5, %c0_6] : memref<8x64xf32, #tpu.memory_space<vmem>>, vector<8x64xf32>
    %c0_7 = arith.constant 0 : index
    %c0_8 = arith.constant 0 : index
    %4 = vector.load %arg4[%c0_7, %c0_8] : memref<16x128xf32, #tpu.memory_space<vmem>>, vector<16x128xf32>
    %c0_9 = arith.constant 0 : index
    %c0_10 = arith.constant 0 : index
    %5 = vector.load %arg5[%c0_9, %c0_10] : memref<32x128xf32, #tpu.memory_space<vmem>>, vector<32x128xf32>
    %cst = arith.constant dense<0.000000e+00> : vector<8x128xf32>
    %6 = tpu.matmul %0, %4, %cst {dimension_numbers = #tpu.dot_dimension_numbers<[1], [0], [0], [1], [0, 0, 1, 1], [], []>} : vector<8x16xf32>, vector<16x128xf32>, vector<8x128xf32> -> vector<8x128xf32>
    %cst_11 = arith.constant dense<0.000000e+00> : vector<8x128xf32>
    %7 = tpu.matmul %1, %5, %cst_11 {dimension_numbers = #tpu.dot_dimension_numbers<[1], [0], [0], [1], [0, 0, 1, 1], [], []>} : vector<8x32xf32>, vector<32x128xf32>, vector<8x128xf32> -> vector<8x128xf32>
    %8 = arith.addf %6, %7 : vector<8x128xf32>
    %c0_12 = arith.constant 0 : index
    %c0_13 = arith.constant 0 : index
    %9 = vector.load %arg6[%c0_12, %c0_13] : memref<1x128xf32, #tpu.memory_space<vmem>>, vector<1x128xf32>
    %10 = vector.broadcast %9 : vector<1x128xf32> to vector<8x128xf32>
    %11 = arith.addf %8, %10 : vector<8x128xf32>
    %12 = vector.extract_strided_slice %11 {offsets = [0, 0], sizes = [8, 32], strides = [1, 1]} : vector<8x128xf32> to vector<8x32xf32>
    %13 = arith.negf %12 : vector<8x32xf32>
    %14 = math.exp %13 : vector<8x32xf32>
    %cst_14 = arith.constant 1.000000e+00 : f32
    %15 = vector.broadcast %cst_14 : f32 to vector<8x32xf32>
    %16 = arith.addf %15, %14 : vector<8x32xf32>
    %17 = arith.divf %15, %16 : vector<8x32xf32>
    %18 = vector.extract_strided_slice %11 {offsets = [0, 32], sizes = [8, 32], strides = [1, 1]} : vector<8x128xf32> to vector<8x32xf32>
    %19 = arith.negf %18 : vector<8x32xf32>
    %20 = math.exp %19 : vector<8x32xf32>
    %cst_15 = arith.constant 1.000000e+00 : f32
    %21 = vector.broadcast %cst_15 : f32 to vector<8x32xf32>
    %22 = arith.addf %21, %20 : vector<8x32xf32>
    %23 = arith.divf %21, %22 : vector<8x32xf32>
    %24 = vector.extract_strided_slice %11 {offsets = [0, 64], sizes = [8, 32], strides = [1, 1]} : vector<8x128xf32> to vector<8x32xf32>
    %25 = math.tanh %24 : vector<8x32xf32>
    %26 = vector.extract_strided_slice %11 {offsets = [0, 96], sizes = [8, 32], strides = [1, 1]} : vector<8x128xf32> to vector<8x32xf32>
    %27 = arith.negf %26 : vector<8x32xf32>
    %28 = math.exp %27 : vector<8x32xf32>
    %cst_16 = arith.constant 1.000000e+00 : f32
    %29 = vector.broadcast %cst_16 : f32 to vector<8x32xf32>
    %30 = arith.addf %29, %28 : vector<8x32xf32>
    %31 = arith.divf %29, %30 : vector<8x32xf32>
    %32 = arith.mulf %23, %2 : vector<8x32xf32>
    %33 = arith.mulf %17, %25 : vector<8x32xf32>
    %34 = arith.addf %32, %33 : vector<8x32xf32>
    %35 = math.tanh %34 : vector<8x32xf32>
    %36 = arith.mulf %31, %35 : vector<8x32xf32>
    %c0_17 = arith.constant 0 : index
    %c0_18 = arith.constant 0 : index
    %37 = vector.load %arg15[%c0_17, %c0_18] : memref<8x32xf32, #tpu.memory_space<vmem>>, vector<8x32xf32>
    tpu.vector_store %arg15[%c0_17, %c0_18], %36 {strides = array<i32>} : memref<8x32xf32, #tpu.memory_space<vmem>>, vector<8x32xf32>,
    %c0_19 = arith.constant 0 : index
    %c0_20 = arith.constant 0 : index
    %38 = vector.load %arg16[%c0_19, %c0_20] : memref<8x32xf32, #tpu.memory_space<vmem>>, vector<8x32xf32>
    tpu.vector_store %arg16[%c0_19, %c0_20], %34 {strides = array<i32>} : memref<8x32xf32, #tpu.memory_space<vmem>>, vector<8x32xf32>,
    %c0_21 = arith.constant 0 : index
    %c0_22 = arith.constant 0 : index
    %39 = vector.load %arg7[%c0_21, %c0_22] : memref<32x32xf32, #tpu.memory_space<vmem>>, vector<32x32xf32>
    %cst_23 = arith.constant dense<0.000000e+00> : vector<8x32xf32>
    %40 = tpu.matmul %36, %39, %cst_23 {dimension_numbers = #tpu.dot_dimension_numbers<[1], [0], [0], [1], [0, 0, 1, 1], [], []>} : vector<8x32xf32>, vector<32x32xf32>, vector<8x32xf32> -> vector<8x32xf32>
    %c0_24 = arith.constant 0 : index
    %c0_25 = arith.constant 0 : index
    %41 = vector.load %arg8[%c0_24, %c0_25] : memref<64x32xf32, #tpu.memory_space<vmem>>, vector<64x32xf32>
    %cst_26 = arith.constant dense<0.000000e+00> : vector<8x32xf32>
    %42 = tpu.matmul %3, %41, %cst_26 {dimension_numbers = #tpu.dot_dimension_numbers<[1], [0], [0], [1], [0, 0, 1, 1], [], []>} : vector<8x64xf32>, vector<64x32xf32>, vector<8x32xf32> -> vector<8x32xf32>
    %43 = arith.addf %40, %42 : vector<8x32xf32>
    %c0_27 = arith.constant 0 : index
    %c0_28 = arith.constant 0 : index
    %44 = vector.load %arg9[%c0_27, %c0_28] : memref<1x32xf32, #tpu.memory_space<vmem>>, vector<1x32xf32>
    %45 = vector.broadcast %44 : vector<1x32xf32> to vector<8x32xf32>
    %46 = arith.addf %43, %45 : vector<8x32xf32>
    %47 = arith.truncf %46 : vector<8x32xf32> to vector<8x32xbf16>
    %c0_29 = arith.constant 0 : index
    %c0_30 = arith.constant 0 : index
    %48 = vector.load %arg17[%c0_29, %c0_30] : memref<8x32xbf16, #tpu.memory_space<vmem>>, vector<8x32xbf16>
    tpu.vector_store %arg17[%c0_29, %c0_30], %47 {strides = array<i32>} : memref<8x32xbf16, #tpu.memory_space<vmem>>, vector<8x32xbf16>,
    %c0_31 = arith.constant 0 : index
    %c0_32 = arith.constant 0 : index
    %49 = vector.load %arg10[%c0_31, %c0_32] : memref<1x64xf32, #tpu.memory_space<vmem>>, vector<1x64xf32>
    %50 = vector.broadcast %49 : vector<1x64xf32> to vector<8x64xf32>
    %51 = arith.mulf %3, %50 : vector<8x64xf32>
    %cst_33 = arith.constant dense<0.000000e+00> : vector<8xf32>
    %52 = vector.multi_reduction <add>, %51, %cst_33 [1] : vector<8x64xf32> to vector<8xf32>
    %53 = vector.shape_cast %52 : vector<8xf32> to vector<8x1xf32>
    %c0_34 = arith.constant 0 : index
    %c0_35 = arith.constant 0 : index
    %54 = vector.load %arg11[%c0_34, %c0_35] : memref<1x32xf32, #tpu.memory_space<vmem>>, vector<1x32xf32>
    %55 = vector.broadcast %54 : vector<1x32xf32> to vector<8x32xf32>
    %56 = arith.mulf %36, %55 : vector<8x32xf32>
    %cst_36 = arith.constant dense<0.000000e+00> : vector<8xf32>
    %57 = vector.multi_reduction <add>, %56, %cst_36 [1] : vector<8x32xf32> to vector<8xf32>
    %58 = vector.shape_cast %57 : vector<8xf32> to vector<8x1xf32>
    %59 = arith.addf %53, %58 : vector<8x1xf32>
    %c0_37 = arith.constant 0 : index
    %c0_38 = arith.constant 0 : index
    %60 = vector.load %arg12[%c0_37, %c0_38] : memref<1x32xf32, #tpu.memory_space<vmem>>, vector<1x32xf32>
    %61 = vector.broadcast %60 : vector<1x32xf32> to vector<8x32xf32>
    %62 = arith.mulf %34, %61 : vector<8x32xf32>
    %cst_39 = arith.constant dense<0.000000e+00> : vector<8xf32>
    %63 = vector.multi_reduction <add>, %62, %cst_39 [1] : vector<8x32xf32> to vector<8xf32>
    %64 = vector.shape_cast %63 : vector<8xf32> to vector<8x1xf32>
    %65 = arith.addf %59, %64 : vector<8x1xf32>
    %c0_40 = arith.constant 0 : index
    %c0_41 = arith.constant 0 : index
    %66 = vector.load %arg13[%c0_40, %c0_41] : memref<1x16xf32, #tpu.memory_space<vmem>>, vector<1x16xf32>
    %67 = vector.broadcast %66 : vector<1x16xf32> to vector<8x16xf32>
    %68 = arith.mulf %0, %67 : vector<8x16xf32>
    %cst_42 = arith.constant dense<0.000000e+00> : vector<8xf32>
    %69 = vector.multi_reduction <add>, %68, %cst_42 [1] : vector<8x16xf32> to vector<8xf32>
    %70 = vector.shape_cast %69 : vector<8xf32> to vector<8x1xf32>
    %71 = arith.addf %65, %70 : vector<8x1xf32>
    %c0_43 = arith.constant 0 : index
    %c0_44 = arith.constant 0 : index
    %72 = vector.load %arg14[%c0_43, %c0_44] : memref<1x1xf32, #tpu.memory_space<vmem>>, vector<1x1xf32>
    %73 = vector.broadcast %72 : vector<1x1xf32> to vector<8x1xf32>
    %74 = arith.addf %71, %73 : vector<8x1xf32>
    %75 = arith.negf %74 : vector<8x1xf32>
    %76 = math.exp %75 : vector<8x1xf32>
    %cst_45 = arith.constant 1.000000e+00 : f32
    %77 = vector.broadcast %cst_45 : f32 to vector<8x1xf32>
    %78 = arith.addf %77, %76 : vector<8x1xf32>
    %79 = arith.divf %77, %78 : vector<8x1xf32>
    %c0_46 = arith.constant 0 : index
    %c0_47 = arith.constant 0 : index
    %80 = vector.load %arg18[%c0_46, %c0_47] : memref<8x1xf32, #tpu.memory_space<vmem>>, vector<8x1xf32>
    tpu.vector_store %arg18[%c0_46, %c0_47], %79 {strides = array<i32>} : memref<8x1xf32, #tpu.memory_space<vmem>>, vector<8x1xf32>,
    return
  }
}

module attributes {stable_mosaic.version = 11 : i64} {
  func.func @vocab_softmax_kernel(%arg0: i32, %arg1: memref<8x32xbf16, #tpu.memory_space<vmem>>, %arg2: memref<32x128xbf16, #tpu.memory_space<vmem>>, %arg3: memref<1x128xf32, #tpu.memory_space<vmem>>, %arg4: memref<8x256xf32, #tpu.memory_space<vmem>>, %arg5: memref<8x1xf32, #tpu.memory_space<vmem>>, %arg6: memref<8x1xf32, #tpu.memory_space<vmem>>) attributes {dimension_semantics = [#tpu.dimension_semantics<arbitrary>], iteration_bounds = array<i64: 2>, scalar_prefetch = 0 : i64, scratch_operands = 2 : i64, tpu.core_type = #tpu.core_type<tc>, window_params = [{pipeline_mode = #tpu.pipeline_mode<synchronous>, transform_indices = @transform_0, window_bounds = array<i64: 8, 32>}, {transform_indices = @transform_1, window_bounds = array<i64: 32, 128>}, {transform_indices = @transform_2, window_bounds = array<i64: 1, 128>}, {pipeline_mode = #tpu.pipeline_mode<synchronous>, transform_indices = @transform_3, window_bounds = array<i64: 8, 256>}]} {
    %c0_i32 = arith.constant 0 : i32
    %0 = arith.cmpi eq, %arg0, %c0_i32 : i32
    %1 = arith.extui %0 : i1 to i32
    %c0_i32_0 = arith.constant 0 : i32
    %2 = arith.cmpi ne, %1, %c0_i32_0 : i32
    scf.if %2 {
      %cst_18 = arith.constant 0xFF800000 : f32
      %32 = vector.broadcast %cst_18 : f32 to vector<8x1xf32>
      %c0_19 = arith.constant 0 : index
      %c0_20 = arith.constant 0 : index
      %33 = vector.load %arg5[%c0_19, %c0_20] : memref<8x1xf32, #tpu.memory_space<vmem>>, vector<8x1xf32>
      tpu.vector_store %arg5[%c0_19, %c0_20], %32 {strides = array<i32>} : memref<8x1xf32, #tpu.memory_space<vmem>>, vector<8x1xf32>,
      %cst_21 = arith.constant 0.000000e+00 : f32
      %34 = vector.broadcast %cst_21 : f32 to vector<8x1xf32>
      %c0_22 = arith.constant 0 : index
      %c0_23 = arith.constant 0 : index
      %35 = vector.load %arg6[%c0_22, %c0_23] : memref<8x1xf32, #tpu.memory_space<vmem>>, vector<8x1xf32>
      tpu.vector_store %arg6[%c0_22, %c0_23], %34 {strides = array<i32>} : memref<8x1xf32, #tpu.memory_space<vmem>>, vector<8x1xf32>,
    } else {
    }
    %c0 = arith.constant 0 : index
    %c0_1 = arith.constant 0 : index
    %3 = vector.load %arg1[%c0, %c0_1] : memref<8x32xbf16, #tpu.memory_space<vmem>>, vector<8x32xbf16>
    %c0_2 = arith.constant 0 : index
    %c0_3 = arith.constant 0 : index
    %4 = vector.load %arg2[%c0_2, %c0_3] : memref<32x128xbf16, #tpu.memory_space<vmem>>, vector<32x128xbf16>
    %cst = arith.constant dense<0.000000e+00> : vector<8x128xf32>
    %5 = tpu.matmul %3, %4, %cst {dimension_numbers = #tpu.dot_dimension_numbers<[1], [0], [0], [1], [0, 0, 1, 1], [], []>} : vector<8x32xbf16>, vector<32x128xbf16>, vector<8x128xf32> -> vector<8x128xf32>
    %c0_4 = arith.constant 0 : index
    %c0_5 = arith.constant 0 : index
    %6 = vector.load %arg3[%c0_4, %c0_5] : memref<1x128xf32, #tpu.memory_space<vmem>>, vector<1x128xf32>
    %7 = vector.broadcast %6 : vector<1x128xf32> to vector<8x128xf32>
    %8 = arith.addf %5, %7 : vector<8x128xf32>
    %c128_i32 = arith.constant 128 : i32
    %9 = arith.muli %arg0, %c128_i32 : i32
    %10 = tpu.assume_multiple %9, 128 : i32
    %c0_6 = arith.constant 0 : index
    %11 = arith.index_cast %10 : i32 to index
    %12 = vector.load %arg4[%c0_6, %11] : memref<8x256xf32, #tpu.memory_space<vmem>>, vector<8x128xf32>
    tpu.vector_store %arg4[%c0_6, %11], %8 {strides = array<i32>} : memref<8x256xf32, #tpu.memory_space<vmem>>, vector<8x128xf32>,
    %c0_7 = arith.constant 0 : index
    %c0_8 = arith.constant 0 : index
    %13 = vector.load %arg5[%c0_7, %c0_8] : memref<8x1xf32, #tpu.memory_space<vmem>>, vector<8x1xf32>
    %cst_9 = arith.constant dense<0xFF800000> : vector<8xf32>
    %14 = vector.multi_reduction <maximumf>, %8, %cst_9 [1] : vector<8x128xf32> to vector<8xf32>
    %15 = vector.shape_cast %14 : vector<8xf32> to vector<8x1xf32>
    %16 = arith.maximumf %13, %15 : vector<8x1xf32>
    %c0_10 = arith.constant 0 : index
    %c0_11 = arith.constant 0 : index
    %17 = vector.load %arg6[%c0_10, %c0_11] : memref<8x1xf32, #tpu.memory_space<vmem>>, vector<8x1xf32>
    %18 = arith.subf %13, %16 : vector<8x1xf32>
    %19 = math.exp %18 : vector<8x1xf32>
    %20 = arith.mulf %17, %19 : vector<8x1xf32>
    %21 = vector.broadcast %16 : vector<8x1xf32> to vector<8x128xf32>
    %22 = arith.subf %8, %21 : vector<8x128xf32>
    %23 = math.exp %22 : vector<8x128xf32>
    %cst_12 = arith.constant dense<0.000000e+00> : vector<8xf32>
    %24 = vector.multi_reduction <add>, %23, %cst_12 [1] : vector<8x128xf32> to vector<8xf32>
    %25 = vector.shape_cast %24 : vector<8xf32> to vector<8x1xf32>
    %26 = arith.addf %20, %25 : vector<8x1xf32>
    %c0_13 = arith.constant 0 : index
    %c0_14 = arith.constant 0 : index
    %27 = vector.load %arg6[%c0_13, %c0_14] : memref<8x1xf32, #tpu.memory_space<vmem>>, vector<8x1xf32>
    tpu.vector_store %arg6[%c0_13, %c0_14], %26 {strides = array<i32>} : memref<8x1xf32, #tpu.memory_space<vmem>>, vector<8x1xf32>,
    %c0_15 = arith.constant 0 : index
    %c0_16 = arith.constant 0 : index
    %28 = vector.load %arg5[%c0_15, %c0_16] : memref<8x1xf32, #tpu.memory_space<vmem>>, vector<8x1xf32>
    tpu.vector_store %arg5[%c0_15, %c0_16], %16 {strides = array<i32>} : memref<8x1xf32, #tpu.memory_space<vmem>>, vector<8x1xf32>,
    %c1_i32 = arith.constant 1 : i32
    %29 = arith.cmpi eq, %arg0, %c1_i32 : i32
    %30 = arith.extui %29 : i1 to i32
    %c0_i32_17 = arith.constant 0 : i32
    %31 = arith.cmpi ne, %30, %c0_i32_17 : i32
    scf.if %31 {
      %c0_18 = arith.constant 0 : index
      %c0_19 = arith.constant 0 : index
      %32 = vector.load %arg6[%c0_18, %c0_19] : memref<8x1xf32, #tpu.memory_space<vmem>>, vector<8x1xf32>
      %33 = tpu.reciprocal %32 : vector<8x1xf32> -> vector<8x1xf32>
      %c0_20 = arith.constant 0 : index
      %c0_21 = arith.constant 0 : index
      %34 = vector.load %arg4[%c0_20, %c0_21] : memref<8x256xf32, #tpu.memory_space<vmem>>, vector<8x256xf32>
      %c0_22 = arith.constant 0 : index
      %c0_23 = arith.constant 0 : index
      %35 = vector.load %arg5[%c0_22, %c0_23] : memref<8x1xf32, #tpu.memory_space<vmem>>, vector<8x1xf32>
      %36 = vector.broadcast %35 : vector<8x1xf32> to vector<8x256xf32>
      %37 = arith.subf %34, %36 : vector<8x256xf32>
      %38 = math.exp %37 : vector<8x256xf32>
      %39 = vector.broadcast %33 : vector<8x1xf32> to vector<8x256xf32>
      %40 = arith.mulf %38, %39 : vector<8x256xf32>
      %c0_24 = arith.constant 0 : index
      %c0_25 = arith.constant 0 : index
      %41 = vector.load %arg4[%c0_24, %c0_25] : memref<8x256xf32, #tpu.memory_space<vmem>>, vector<8x256xf32>
      tpu.vector_store %arg4[%c0_24, %c0_25], %40 {strides = array<i32>} : memref<8x256xf32, #tpu.memory_space<vmem>>, vector<8x256xf32>,
    } else {
    }
    return
  }
  func.func @transform_0(%arg0: i32) -> (i32, i32) {
    %c0_i32 = arith.constant 0 : i32
    %c0_i32_0 = arith.constant 0 : i32
    %c0_i32_1 = arith.constant 0 : i32
    return %c0_i32, %c0_i32_0 : i32, i32
  }
  func.func @transform_1(%arg0: i32) -> (i32, i32) {
    %c0_i32 = arith.constant 0 : i32
    %c0_i32_0 = arith.constant 0 : i32
    return %c0_i32, %arg0 : i32, i32
  }
  func.func @transform_2(%arg0: i32) -> (i32, i32) {
    %c0_i32 = arith.constant 0 : i32
    %c0_i32_0 = arith.constant 0 : i32
    return %c0_i32, %arg0 : i32, i32
  }
  func.func @transform_3(%arg0: i32) -> (i32, i32) {
    %c0_i32 = arith.constant 0 : i32
    %c0_i32_0 = arith.constant 0 : i32
    %c0_i32_1 = arith.constant 0 : i32
    return %c0_i32, %c0_i32_0 : i32, i32
  }
}

</mosaic_0001>

<bundles_post_ra>
// kernel: decoder_forward.3
= control target key start
LH: loop header
LB: loop body
LE: loop exit
PB: predicated region body
PF: predicated region fallthrough
CT: control target
= control target key end

     0   :  { %s526_s12 = smov 0   ;;  %s528_s13 = smov 0   ;;  %s603_s0 = inlined_call_operand.vmem [shape: bf16[8,32], index: 0, kind: input, shape index: {}]   ;;  %s604_s1 = inlined_call_operand.vmem [shape: bf16[32,256], index: 1, kind: input, shape index: {}]   ;;  %s605_s2 = inlined_call_operand.vmem [shape: f32[1,256], index: 2, kind: input, shape index: {}]   ;;  %s606_s3 = inlined_call_operand.vmem [shape: f32[8,256], index: 3, kind: output, shape index: {}]  }
   0x1   :  { %s530_s14 = smov 0  }
   0x2 LB: > { %s542_s15 = sadd.s32 4294967295, %s498_s14   ;;  %s545_s16 = sadd.s32 1, %s498_s14   ;;  %s498_s14 = sphi %s530_s14, %s609_s14   ;;  %s494_s13 = sphi %s528_s13, %s608_s13   ;;  %s490_s12 = sphi %s526_s12, %s607_s12  }
   0x3   : > { %s38_s17 = ssub.s32 %s498_s14, %s545_s16  ;;  %s41_s18 = sadd.s32 1, %s494_s13 }
   0x4   : > { %p39_p0 = scmp.eq.s32.totalorder %s38_s17, 0  ;;  %p48_p1 = scmp.ne.s32.totalorder %s494_s13, %s490_s12 }
   0x5   : > { %p49_p2 = scmp.eq.s32.totalorder %s498_s14, 0  ;;  %p406_p4 = scmp.ge.s32.totalorder %s498_s14, 2 }
   0x6   : > { %s554_s19 = scalar_select %p39_p0, %s494_s13, %s41_s18  }
   0x7   : > { %p50_p3 = por %p49_p2, %p48_p1  ;;  %124 = sbr.rel (%p406_p4) target bundleno = 18 (0x12), region = 20 }
   0xc   : > { %127 = sbr.rel (!%p50_p3) target bundleno = 18 (0x12), region = 24  ;;  %s129_s20 = sand.u32 (%p50_p3), 1, %s494_s13  }
   0xd   : > { %s408_s21 = sshll.u32 (%p50_p3), %s498_s14, 2  ;;  %s407_s22 = sshll.u32 (%p50_p3), %s129_s20, 4 }
   0xe   : > { %s133_s25 = scalar_lea.vmem (%p50_p3), %s604_s1, %s408_s21  ;;  %s131_s26 = scalar_lea.vmem (%p50_p3), [#allocation4], %s407_s22 }
   0xf   : > { %v150_v0 = vld [vmem:[%s133_s25] sm:$0xf] (%p50_p3)  ;;  %v152_v1 = vld [vmem:[%s133_s25 + $0x8] sm:$0xf] (%p50_p3)  ;;  %v154_v2 = vld [vmem:[%s133_s25 + $0x10] sm:$0xf] (%p50_p3) }
  0x10   : > { %151 = vst [vmem:[%s131_s26] sm:$0xf] (%p50_p3), %v150_v0  ;;  %153 = vst [vmem:[%s131_s26 + $0x4] sm:$0xf] (%p50_p3), %v152_v1  ;;  %v156_v3 = vld [vmem:[%s133_s25 + $0x18] sm:$0xf] (%p50_p3) }
  0x11   : > { %155 = vst [vmem:[%s131_s26 + $0x8] sm:$0xf] %v154_v2  ;;  %157 = vst [vmem:[%s131_s26 + $0xc] sm:$0xf] %v156_v3 }
  0x12 PF: > { %p409_p5 = scmp.ge.s32.totalorder %s498_s14, 1  ;;  %p194_p6 = scmp.lt.s32.totalorder %s498_s14, 3 }
  0x14   : > { %p195_p7 = pnand %p409_p5, %p194_p6 }
  0x15   : > { %s201_s27 = sand.u32 (!%p195_p7), 1, %s490_s12   ;;  %p222_p8 = scmp.lt.s32.totalorder (!%p195_p7), %s542_s15, 1 }
  0x16   : > { %198 = sbr.rel (%p195_p7) target bundleno = 810 (0x32a), region = 69  ;;  %s410_s28 = sshll.u32 (!%p195_p7), %s201_s27, 4 }
  0x17   : > { %s203_s6 = scalar_lea.vmem (!%p195_p7), [#allocation4], %s410_s28  ;;  %p411_p9 = scmp.ne.s32.totalorder (!%p195_p7), %s542_s15, 0 }
  0x1b   : > { %s223_s29 = scalar_select %p222_p8, %s542_s15, 1 }
  0x1c   : > { %229 = sbr.rel (%p411_p9) target bundleno = 35 (0x23), region = 77 }
  0x1d   : > { %s224_s5 = scalar_lea.vmem %s605_s2, %s223_s29 }
  0x21   : > { %vm230_vm0 = vcmask 7168   ;;  %v500_v4 = vmov -inf   ;;  %v501_v5 = vmov 0.0  }
  0x22   : > { %231 = vst.msk [vmem:[#allocation2] sm:$0xff] %vm230_vm0, %v500_v4  ;;  %232 = vst.msk [vmem:[#allocation3] sm:$0xff] %vm230_vm0, %v501_v5 }
  0x23 PF: > { %v463_v6 = vld [vmem:[%s203_s6 + $0x8] sm:$0xff]   ;;  %v502_v7 = vmov 0.0   ;;  %v464_v8 = vld [vmem:[%s203_s6] sm:$0xff]   ;;  %vm503_vm1 = vmmov 0   ;;  %vm257_vm2 = vcmask 261120   ;;  %s416_s9 = sshll.u32 %s542_s15, 7 }
  0x24   : > { %424 = vmatprep.subr.bf16.mxu0 %v502_v7  ;;  %428 = vmatprep.mubr.msk.bf16.mxu0 %vm503_vm1, %v502_v7  ;;  %v233_v9 = vld [vmem:[%s603_s0] sm:$0xf]  ;;  %s302_s10 = sshra.s32 %s416_s9, 7  ;;  %v504_v16 = vmov 0   ;;  %vm327_vm3 = vcmask 7168   ;;  %p418_p10 = scmp.ne.s32.totalorder %s542_s15, 1 }
  0x25   : > { %425 = vmatpush3.bf16.msra.mxu0 %v463_v6  ;;  %s417_s11 = sshll.u32 %s302_s10, 3  ;;  %v412_v10 = vld [vmem:[%s224_s5] ss:$0 sm:$0xff]  ;;  %462 = vset.pattern.permute.xlu0 %v504_v16 }
  0x26   : > { %426 = vmatprep.subr.bf16.mxu0 %v502_v7  ;;  %s305_s17 = scalar_lea.vmem %s606_s3, %s417_s11 }
  0x29   : > { %427 = vmatpush3.bf16.msra.mxu0 %v464_v8  ;;  %v307_v17 = vld [vmem:[#allocation2] sm:$0xff]  ;;  %v311_v27 = vld [vmem:[#allocation3] sm:$0xff] }
  0x2c   : > { %429 = vmatmul.mubr.msk.bf16.vlgmr.msra.gmra.mxu0 %vm257_vm2, %v233_v9 }
  0xec   : > { %v295_v11 = vpop.f32.mrf.mxu0 }
  0xed   : > { %v296_v12 = vadd.f32 %v412_v10, %v295_v11 }
  0xee   : > { %v430_v13 = vpop.f32.mrf.mxu0 }
  0xef   : > { %306 = vst [vmem:[%s305_s17] sm:$0xff] %v296_v12  ;;  %308 = vmax.xlane.f32.xlu0 %v296_v12 }
  0xf0   : > { %v298_v14 = vpop.f32.mrf.mxu0 }
  0xf2   : > { %v431_v15 = vpop.f32.mrf.mxu0 }
 0x178   : > { %v309_v18 = vpop.xlane.xlu0 %308 }
 0x179   : > { %v310_v19 = vmax.f32 %v307_v17, %v309_v18 }
 0x17b   : > { %v312_v20 = vsub.f32 %v307_v17, %v310_v19  ;;  %329 = vst.msk [vmem:[#allocation2] sm:$0xff] %vm327_vm3, %v310_v19  ;;  %318 = vperm.xlu0 %462, %v310_v19  }
 0x17d   : > { %v313_v25 = vmul.f32 1.442695, %v312_v20 }
 0x1f6   : > { %v319_v21 = vpop.permute.xlu0 %318 }
 0x1f7   : > { %v321_v22 = vsub.f32 %v296_v12, %v319_v21 }
 0x1f9   : > { %v322_v23 = vmul.f32 1.442695, %v321_v22 }
 0x1fb   : > { %465 = vpow2.f32 %v322_v23 }
 0x1fc   : > { %467 = vpow2.f32 %v313_v25 }
 0x208   : > { %v466_v24 = vpop.eup %465 }
 0x209   : > { %324 = vadd.xlane.f32.xlu1 %v466_v24  ;;  %v468_v26 = vpop.eup %467 }
 0x20a   : > { %v315_v28 = vmul.f32 %v468_v26, %v311_v27 }
 0x291   : > { %333 = sbr.rel (%p418_p10) target bundleno = 810 (0x32a), region = 81 }
 0x292   : > { %v325_v29 = vpop.xlane.xlu1 %324 }
 0x293   : > { %v326_v30 = vadd.f32 %v325_v29, %v315_v28 }
 0x295   : > { %328 = vst.msk [vmem:[#allocation3] sm:$0xff] %vm327_vm3, %v326_v30 }
 0x296   : > { %v338_v31 = vld [vmem:[#allocation2] sm:$0xff]  ;;  %v505_v33 = vmov 0   ;;  %v337_v36 = vld [vmem:[%s606_s3 + $0x8] sm:$0xff] }
 0x297   : > { %469 = vset.pattern.permute.xlu0 %v505_v33  ;;  %v336_v35 = vld [vmem:[%s606_s3] sm:$0xff] }
 0x298   : > { %341 = vperm.xlu0 %469, %v338_v31  }
 0x29c   : > { %v334_v32 = vld [vmem:[#allocation3] sm:$0xff] }
 0x29d   : > { %470 = vrcp.f32 %v334_v32 }
 0x2aa   : > { %v471_v34 = vpop.eup %470 }
 0x2ab   : > { %352 = vperm.xlu0 %469, %v471_v34  }
 0x313   : > { %v342_v37 = vpop.permute.xlu0 %341 }
 0x314   : > { %v344_v38 = vsub.f32 %v336_v35, %v342_v37  ;;  %v345_v39 = vsub.f32 %v337_v36, %v342_v37 }
 0x316   : > { %v346_v40 = vmul.f32 1.442695, %v344_v38  ;;  %v348_v41 = vmul.f32 1.442695, %v345_v39 }
 0x318   : > { %472 = vpow2.f32 %v346_v40 }
 0x319   : > { %474 = vpow2.f32 %v348_v41 }
 0x325   : > { %v473_v42 = vpop.eup %472 }
 0x326   : > { %v353_v43 = vpop.permute.xlu0 %352  ;;  %v475_v44 = vpop.eup %474 }
 0x327   : > { %v355_v45 = vmul.f32 %v473_v42, %v353_v43  ;;  %v356_v46 = vmul.f32 %v475_v44, %v353_v43 }
 0x329   : > { %357 = vst [vmem:[%s606_s3] sm:$0xff] %v355_v45  ;;  %358 = vst [vmem:[%s606_s3 + $0x8] sm:$0xff] %v356_v46 }
 0x32a PF: > { %p10_p11 = scmp.ge.s32.totalorder %s545_s16, 4   ;;  %s607_s12 = smov %s494_s13 }
 0x32b   : > { %s608_s13 = smov %s554_s19  ;;  %s609_s14 = smov %s545_s16 }
 0x32c   :  { %12 = sbr.rel (!%p10_p11) target bundleno = 2 (0x2), region = 116 }

// kernel: decoder_forward.2
= control target key start
LH: loop header
LB: loop body
LE: loop exit
PB: predicated region body
PF: predicated region fallthrough
CT: control target
= control target key end

     0   :  { %v620_v0 = vmov 0.0   ;;  %vm140_vm0 = vcmask 130048   ;;  %vm621_vm1 = vmmov 0   ;;  %vm66_vm2 = vcmask 261120   ;;  %s622_s19 = smov 64   ;;  %s623_s21 = smov 32   ;;  %s868_s5 = inlined_call_operand.vmem [shape: f32[32,128], index: 5, kind: input, shape index: {}]   ;;  %s869_s4 = inlined_call_operand.vmem [shape: f32[16,128], index: 4, kind: input, shape index: {}]   ;;  %s870_s0 = inlined_call_operand.vmem [shape: f32[8,16], index: 0, kind: input, shape index: {}]   ;;  %s871_s1 = inlined_call_operand.vmem [shape: f32[8,32], index: 1, kind: input, shape index: {}]   ;;  %s872_s6 = inlined_call_operand.vmem [shape: f32[1,128], index: 6, kind: input, shape index: {}]   ;;  %s873_s2 = inlined_call_operand.vmem [shape: f32[8,32], index: 2, kind: input, shape index: {}]   ;;  %s874_s8 = inlined_call_operand.vmem [shape: f32[64,32], index: 8, kind: input, shape index: {}]   ;;  %s875_s7 = inlined_call_operand.vmem [shape: f32[32,32], index: 7, kind: input, shape index: {}]   ;;  %s876_s11 = inlined_call_operand.vmem [shape: f32[1,32], index: 11, kind: input, shape index: {}]   ;;  %s877_s3 = inlined_call_operand.vmem [shape: f32[8,64], index: 3, kind: input, shape index: {}]   ;;  %s878_s12 = inlined_call_operand.vmem [shape: f32[1,32], index: 12, kind: input, shape index: {}]   ;;  %s879_s10 = inlined_call_operand.vmem [shape: f32[1,64], index: 10, kind: input, shape index: {}]   ;;  %s880_s13 = inlined_call_operand.vmem [shape: f32[1,16], index: 13, kind: input, shape index: {}]   ;;  %s881_s15 = inlined_call_operand.vmem [shape: f32[8,32], index: 15, kind: output, shape index: {0}]   ;;  %s882_s14 = inlined_call_operand.<no memory space> [shape: f32[1,1], index: 14, kind: input, shape index: {}]   ;;  %s883_s9 = inlined_call_operand.vmem [shape: f32[1,32], index: 9, kind: input, shape index: {}]   ;;  %s884_s17 = inlined_call_operand.vmem [shape: bf16[8,32], index: 17, kind: output, shape index: {2}]   ;;  %s885_s16 = inlined_call_operand.vmem [shape: f32[8,32], index: 16, kind: output, shape index: {1}]   ;;  %s886_s18 = inlined_call_operand.vmem [shape: f32[8,1], index: 18, kind: output, shape index: {3}]  }
   0x1   :  { %889 = sst [smem:[#allocation3_spill]] %s868_s5  ;;  %555 = vmatprep.subr.mxu0 %v620_v0  ;;  %566 = vmatprep.subr.mxu1 %v620_v0  ;;  %v57_v8 = vld [vmem:[%s871_s1] sm:$0xff]  ;;  %v271_v28 = vld [vmem:[%s874_s8 + $0x38] sm:$0xff]  ;;  %v270_v29 = vld [vmem:[%s874_s8 + $0x30] sm:$0xff]  ;;  %s624_s24 = smov 96   ;;  %vm272_vm3 = vcmask 523264   ;;  %v24_v63 = vstv %s882_s14 }
   0x2   :  { %890 = sst [smem:[#allocation4_spill]] %s869_s4  ;;  %570 = vmatprep.mubr.msk.f32.mxu1 %vm621_vm1, %v620_v0  ;;  %563 = vmatprep.mubr.msk.f32.mxu0 %vm621_vm1, %v620_v0  ;;  %v522_v12 = vld [vmem:[%s872_s6] ss:$0 sm:$0xff]  ;;  %v263_v30 = vld [vmem:[%s875_s7 + $0x18] sm:$0xff]  ;;  %v269_v31 = vld [vmem:[%s874_s8 + $0x28] sm:$0xff]  ;;  %vm427_vm4 = vcmask 257024  }
   0x3   :  { %891 = sst [smem:[#allocation5_spill]] %s870_s0  ;;  %v58_v17 = vld [vmem:[%s873_s2] sm:$0xff]  ;;  %v262_v32 = vld [vmem:[%s875_s7 + $0x10] sm:$0xff]  ;;  %v261_v34 = vld [vmem:[%s875_s7 + $0x8] sm:$0xff]  ;;  %25 = vst [vmem:[#allocation2] sm:$0x1] %v24_v63 }
   0x4   :  { %s892_s29 = sld [smem:[#allocation3_spill]]  ;;  %v268_v33 = vld [vmem:[%s874_s8 + $0x20] sm:$0xff]  ;;  %v267_v36 = vld [vmem:[%s874_s8 + $0x18] sm:$0xff]  ;;  %v266_v39 = vld [vmem:[%s874_s8 + $0x10] sm:$0xff]  ;;  %vm502_vm5 = vcmask 7168  }
   0x5   :  { %s893_s20 = sld [smem:[#allocation4_spill]]  ;;  %v260_v37 = vld [vmem:[%s875_s7] sm:$0xff]  ;;  %v265_v40 = vld [vmem:[%s874_s8 + $0x8] sm:$0xff] }
   0x6   :  { %s894_s26 = sld [smem:[#allocation5_spill]]  ;;  %v528_v38 = vld [vmem:[%s876_s11] ss:$0 sm:$0xff] }
   0x7   :  { %v264_v41 = vld [vmem:[%s874_s8] sm:$0xff] }
   0x8   :  { %v59_v42 = vld [vmem:[%s877_s3] sm:$0xff] }
   0x9   :  { %v529_v46 = vld [vmem:[%s878_s12] ss:$0 sm:$0xff] }
   0xa   :  { %v65_v1 = vld [vmem:[%s892_s29 + $0x18] sm:$0xff]  ;;  %v64_v2 = vld [vmem:[%s892_s29 + $0x10] sm:$0xff]  ;;  %v63_v5 = vld [vmem:[%s892_s29 + $0x8] sm:$0xff] }
   0xb   :  { %v61_v3 = vld [vmem:[%s893_s20 + $0x8] sm:$0xff]  ;;  %556 = vmatpush3.msra.mxu0 %v65_v1  ;;  %v60_v4 = vld [vmem:[%s893_s20] sm:$0xff] }
   0xc   :  { %567 = vmatpush3.msra.mxu1 %v61_v3  ;;  %557 = vmatprep.subr.mxu0 %v620_v0  ;;  %v742_v6 = vld [vmem:[%s894_s26] sm:$0xff] }
   0xd   :  { %568 = vmatprep.subr.mxu1 %v620_v0  ;;  %558 = vmatpush3.msra.mxu0 %v64_v2  ;;  %v62_v7 = vld [vmem:[%s892_s29] sm:$0xff] }
   0xe   :  { %569 = vmatpush3.msra.mxu1 %v60_v4  ;;  %559 = vmatprep.subr.mxu0 %v620_v0  ;;  %v527_v48 = vld [vmem:[%s879_s10] ss:$0 sm:$0xff] }
   0xf   :  { %560 = vmatpush3.msra.mxu0 %v63_v5  ;;  %571 = vmatmul.mubr.msk.f32.vlgmr.msra.gmra.mxu1 %vm140_vm0, %v742_v6  ;;  %v436_v49 = vmul.f32 %v527_v48, %v59_v42  ;;  %v530_v51 = vld [vmem:[%s880_s13] ss:$0 sm:$0xff] }
  0x10   :  { %561 = vmatprep.subr.mxu0 %v620_v0  ;;  %573 = vmatprep.subr.mxu1 %v620_v0  ;;  %v483_v52 = vmul.f32 %v530_v51, %v742_v6  ;;  %v526_v1 = vld [vmem:[%s883_s9] ss:$0 sm:$0xff] }
  0x11   :  { %562 = vmatpush3.msra.mxu0 %v62_v7  ;;  %589 = vmatprep.mubr.msk.f32.mxu1 %vm621_vm1, %v620_v0  ;;  %v437_v50 = vsel %vm272_vm3, %v436_v49, 0.0 }
  0x12   :  { %564 = vmatmul.mubr.msk.f32.vlgmr.msra.gmra.mxu0 %vm66_vm2, %v57_v8  ;;  %592 = vmatprep.subr.mxu0 %v620_v0  ;;  %v484_v53 = vsel %vm140_vm0, %v483_v52, 0.0 }
  0x13   :  { %600 = vmatprep.mubr.msk.f32.mxu0 %vm621_vm1, %v620_v0  ;;  %574 = vmatpush3.msra.mxu1 %v271_v28 }
  0x14   :  { %575 = vmatprep.subr.mxu1 %v620_v0  ;;  %593 = vmatpush3.msra.mxu0 %v263_v30 }
  0x15   :  { %576 = vmatpush3.msra.mxu1 %v270_v29  ;;  %594 = vmatprep.subr.mxu0 %v620_v0 }
  0x16   :  { %577 = vmatprep.subr.mxu1 %v620_v0  ;;  %595 = vmatpush3.msra.mxu0 %v262_v32 }
  0x17   :  { %578 = vmatpush3.msra.mxu1 %v269_v31  ;;  %596 = vmatprep.subr.mxu0 %v620_v0 }
  0x18   :  { %579 = vmatprep.subr.mxu1 %v620_v0  ;;  %597 = vmatpush3.msra.mxu0 %v261_v34 }
  0x19   :  { %580 = vmatpush3.msra.mxu1 %v268_v33  ;;  %598 = vmatprep.subr.mxu0 %v620_v0 }
  0x1a   :  { %581 = vmatprep.subr.mxu1 %v620_v0  ;;  %599 = vmatpush3.msra.mxu0 %v260_v37 }
  0x1b   :  { %582 = vmatpush3.msra.mxu1 %v267_v36 }
  0x1c   :  { %583 = vmatprep.subr.mxu1 %v620_v0 }
  0x1d   :  { %584 = vmatpush3.msra.mxu1 %v266_v39 }
  0x1e   :  { %585 = vmatprep.subr.mxu1 %v620_v0 }
  0x1f   :  { %586 = vmatpush3.msra.mxu1 %v265_v40 }
  0x20   :  { %587 = vmatprep.subr.mxu1 %v620_v0 }
  0x21   :  { %588 = vmatpush3.msra.mxu1 %v264_v41 }
  0x22   :  { %590 = vmatmul.mubr.msk.f32.vlgmr.msra.gmra.mxu1 %vm272_vm3, %v59_v42 }
  0xcf   :  { %v210_v9 = vpop.f32.mrf.mxu1 }
  0xd1   :  { %v572_v10 = vpop.f32.mrf.mxu1 }
  0xd2   :  { %v136_v11 = vpop.f32.mrf.mxu0 }
  0xd3   :  { %v211_v13 = vadd.f32 %v210_v9, %v136_v11 }
  0xd4   :  { %v565_v14 = vpop.f32.mrf.mxu0 }
  0xd5   :  { %v221_v15 = vadd.f32 %v522_v12, %v211_v13  ;;  %v531_v12 = vld [vmem:[#allocation2] ss:$0 sm:$0xff] }
  0xd7   :  { %608 = vtanh.f32 %v221_v15  ;;  %v523_v18 = vmul.f32 -1.442695, %v221_v15 }
  0xd9   :  { %610 = vpow2.f32 %v523_v18 }
  0xe2   :  { %v342_v59 = vpop.f32.mrf.mxu1 }
  0xe4   :  { %v609_v16 = vpop.eup %608  ;;  %v591_v60 = vpop.f32.mrf.mxu1 }
  0xe5   :  { %235 = vrot.lane.b32.xlu0 %v609_v16, %s622_s19 }
  0xe6   :  { %v611_v19 = vpop.eup %610 }
  0xe7   :  { %v225_v20 = vadd.f32 1.0, %v611_v19 }
  0xe9   :  { %230 = vrot.lane.b32.xlu0 %v58_v17, %s623_s21  ;;  %612 = vrcp.f32 %v225_v20 }
  0xf6   :  { %v613_v21 = vpop.eup %612 }
 0x157   :  { %v236_v22 = vpop.permute.xlu0 %235 }
 0x158   :  { %v238_v23 = vmul.f32 %v613_v21, %v236_v22 }
 0x15a   :  { %240 = vrot.lane.b32.xlu1 %v238_v23, %s623_s21 }
 0x15b   :  { %v231_v24 = vpop.permute.xlu0 %230 }
 0x15c   :  { %v233_v25 = vmul.f32 %v613_v21, %v231_v24 }
 0x1cc   :  { %v241_v26 = vpop.permute.xlu1 %240 }
 0x1cd   :  { %v770_v27 = vadd.f32 %v241_v26, %v233_v25 }
 0x1cf   :  { %614 = vtanh.f32 %v770_v27 }
 0x1dc   :  { %v615_v35 = vpop.eup %614 }
 0x1dd   :  { %246 = vrot.lane.b32.xlu1 %v615_v35, %s622_s19 }
 0x1e1   :  { %446 = vrot.lane.b32.xlu1 %v528_v38, %s624_s24 }
 0x24f   :  { %v247_v43 = vpop.permute.xlu1 %246 }
 0x250   :  { %v249_v44 = vmul.f32 %v613_v21, %v247_v43 }
 0x252   :  { %251 = vrot.lane.b32.xlu0 %v249_v44, %s623_s21 }
 0x253   :  { %v447_v45 = vpop.permute.xlu1 %446 }
 0x254   :  { %v449_v47 = vmul.f32 %v447_v45, %v249_v44 }
 0x256   :  { %464 = vrot.lane.b32.xlu0 %v529_v46, %s623_s21  ;;  %451 = vrot.lane.b32.xlu1 %v449_v47, %s623_s21 }
 0x27a   :  { %438 = vadd.xlane.f32.xlu1 %v437_v50 }
 0x27e   :  { %485 = vadd.xlane.f32.xlu1 %v484_v53 }
 0x2c4   :  { %v252_v54 = vpop.permute.xlu0 %251 }
 0x2c5   :  { %254 = vst.msk [vmem:[%s881_s15] sm:$0xff] %vm66_vm2, %v252_v54  ;;  %601 = vmatmul.mubr.msk.f32.vlgmr.msra.gmra.mxu0 %vm66_vm2, %v252_v54 }
 0x2c8   :  { %v465_v55 = vpop.permute.xlu0 %464  ;;  %v452_v57 = vpop.permute.xlu1 %451 }
 0x2c9   :  { %v467_v56 = vmul.f32 %v465_v55, %v770_v27  ;;  %v454_v58 = vsel %vm66_vm2, %v452_v57, 0.0 }
 0x2cb   :  { %469 = vrot.lane.b32.xlu0 %v467_v56, %s624_s24 }
 0x2ea   :  { %455 = vadd.xlane.f32.xlu0 %v454_v58 }
 0x303   :  { %v439_v7 = vpop.xlane.xlu1 %438 }
 0x307   :  { %v486_v10 = vpop.xlane.xlu1 %485 }
 0x33d   :  { %v470_v61 = vpop.permute.xlu0 %469 }
 0x33e   :  { %v472_v62 = vsel %vm66_vm2, %v470_v61, 0.0 }
 0x33f   :  { %473 = vadd.xlane.f32.xlu0 %v472_v62 }
 0x355   :  { %256 = vrot.lane.b32.xlu0 %v770_v27, %s624_s24 }
 0x373   :  { %v456_v6 = vpop.xlane.xlu0 %455 }
 0x374   :  { %v457_v8 = vadd.f32 %v456_v6, %v439_v7 }
 0x385   :  { %v414_v0 = vpop.f32.mrf.mxu0 }
 0x386   :  { %v415_v2 = vadd.f32 %v414_v0, %v342_v59 }
 0x387   :  { %v602_v3 = vpop.f32.mrf.mxu0 }
 0x388   :  { %v425_v4 = vadd.f32 %v526_v1, %v415_v2 }
 0x38a   :  { %v426_v5 = vpack.c.bf16 %v425_v4, %v425_v4 }
 0x38c   :  { %428 = vst.msk [vmem:[%s884_s17] sm:$0xf] %vm427_vm4, %v426_v5 }
 0x3c8   :  { %v474_v9 = vpop.xlane.xlu0 %473 }
 0x3c9   :  { %v475_v11 = vadd.f32 %v474_v9, %v457_v8 }
 0x3cb   :  { %v487_v13 = vadd.f32 %v486_v10, %v475_v11 }
 0x3cc   :  { %v257_v14 = vpop.permute.xlu0 %256 }
 0x3cd   :  { %v495_v15 = vadd.f32 %v531_v12, %v487_v13  ;;  %259 = vst.msk [vmem:[%s885_s16] sm:$0xff] %vm66_vm2, %v257_v14 }
 0x3cf   :  { %v532_v16 = vmul.f32 -1.442695, %v495_v15 }
 0x3d1   :  { %616 = vpow2.f32 %v532_v16 }
 0x3de   :  { %v617_v17 = vpop.eup %616 }
 0x3df   :  { %v499_v18 = vadd.f32 1.0, %v617_v17 }
 0x3e1   :  { %618 = vrcp.f32 %v499_v18 }
 0x3ee   :  { %v619_v19 = vpop.eup %618 }
 0x3ef   :  { %503 = vst.msk [vmem:[%s886_s18] sm:$0xff] %vm502_vm5, %v619_v19 }

</bundles_post_ra>
